<compile_context>
chip_gen: v6e
topology: v6e:2x2x1
jax: 0.10.0
libtpu: 0.0.40
codegen_flags: <defaults>
</compile_context>

<pallas_src>
import jax
import jax.numpy as jnp
from jax.experimental import pallas as pl
from jax.experimental.pallas import tpu as pltpu

K_IN = 784          # nn.Linear in_features
N_OUT = 10          # nn.Linear out_features
K_PAD = 896         # next multiple of 128 above 784
N_PAD = 128         # lane-dense output width
TB_MAX = 1024       # batch tile for the gridded path (fits v5e/v6e/v7x VMEM easily)


def _lowest_kernel(x_ref, w_ref, b_ref, o_ref):
    # x_ref: (TB, 896) bf16   w_ref: (896, 128) bf16
    # b_ref: (1, 128)  f32    o_ref: (TB, 128)  f32
    x = jnp.maximum(x_ref[...], 0.0)                   # ReLU (bf16; commutes with rounding)
    acc = jnp.dot(x, w_ref[...],                       # MXU, f32 accumulate
                  preferred_element_type=jnp.float32)
    o_ref[...] = acc + b_ref[...]                      # lane-dense (TB, 128) store


def prepare_lowest_params(weight_oi, bias):
    """One-time param prep.  weight_oi: PyTorch-layout (10, 784); bias: (10,)."""
    w = jnp.asarray(weight_oi, jnp.float32).T                       # (784, 10)
    w_pad = jnp.pad(w, ((0, K_PAD - K_IN), (0, N_PAD - N_OUT)))     # (896, 128)
    w_pad = w_pad.astype(jnp.bfloat16)
    b_pad = jnp.pad(jnp.asarray(bias, jnp.float32).reshape(1, N_OUT),
                    ((0, 0), (0, N_PAD - N_OUT)))                   # (1, 128) f32
    return w_pad, b_pad


def _lowest_forward_impl(x_nchw, w_pad, b_pad):
    """x_nchw: (B, C, H, W) with C*H*W == 784; w_pad: (896,128) bf16; b_pad: (1,128) f32."""
    B = x_nchw.shape[0]
    x_flat = x_nchw.reshape(B, -1).astype(jnp.bfloat16)   # Flatten + bf16 (halves x DMA)

    B_pad = max(16, ((B + 15) // 16) * 16)                 # bf16 packs 16 rows / vreg

    if B_pad <= TB_MAX:
        # Tiny batch: single invocation, whole problem VMEM-resident, no grid.
        x_pad = jnp.pad(x_flat, ((0, B_pad - B), (0, K_PAD - K_IN)))
        out_pad = pl.pallas_call(
            _lowest_kernel,
            out_shape=jax.ShapeDtypeStruct((B_pad, N_PAD), jnp.float32),
            in_specs=[
                pl.BlockSpec(memory_space=pltpu.MemorySpace.VMEM),
                pl.BlockSpec(memory_space=pltpu.MemorySpace.VMEM),
                pl.BlockSpec(memory_space=pltpu.MemorySpace.VMEM),
            ],
            out_specs=pl.BlockSpec(memory_space=pltpu.MemorySpace.VMEM),
        )(x_pad, w_pad, b_pad)
    else:
        # Large batch: 1-D grid over batch tiles; weight/bias stay VMEM-resident
        # (index_map constant), x/out stream and pipeline against the MXU.
        TB = TB_MAX
        B_pad = ((B_pad + TB - 1) // TB) * TB
        x_pad = jnp.pad(x_flat, ((0, B_pad - B), (0, K_PAD - K_IN)))
        out_pad = pl.pallas_call(
            _lowest_kernel,
            out_shape=jax.ShapeDtypeStruct((B_pad, N_PAD), jnp.float32),
            grid=(B_pad // TB,),
            in_specs=[
                pl.BlockSpec((TB, K_PAD), lambda i: (i, 0)),
                pl.BlockSpec((K_PAD, N_PAD), lambda i: (0, 0)),
                pl.BlockSpec((1, N_PAD), lambda i: (0, 0)),
            ],
            out_specs=pl.BlockSpec((TB, N_PAD), lambda i: (i, 0)),
            compiler_params=pltpu.CompilerParams(
                dimension_semantics=("parallel",)),
        )(x_pad, w_pad, b_pad)

    return out_pad[:B, :N_OUT]


# jit the wrapper so reshape / bf16-cast / pad / slice glue fuses around the call.
lowest_forward = jax.jit(_lowest_forward_impl)


if __name__ == "__main__":
    key = jax.random.PRNGKey(0)
    k_x, k_w, k_b = jax.random.split(key, 3)

    # MNIST-like input implied by Linear(784, 10): (B, 1, 28, 28)
    B = 2
    x = jax.random.normal(k_x, (B, 1, 28, 28), dtype=jnp.float32)

    # nn.Linear default init, PyTorch layout (out_features, in_features) = (10, 784).
    bound = 1.0 / jnp.sqrt(784.0)
    weight_oi = jax.random.uniform(k_w, (N_OUT, K_IN), minval=-bound, maxval=bound,
                                   dtype=jnp.float32)
    bias = jax.random.uniform(k_b, (N_OUT,), minval=-bound, maxval=bound,
                              dtype=jnp.float32)

    # One-time (init-time) param prep: transpose + pad + bf16 cast.
    w_pad, b_pad = prepare_lowest_params(weight_oi, bias)
    w_pad, b_pad = jax.block_until_ready((w_pad, b_pad))

    out = lowest_forward(x, w_pad, b_pad)
    jax.block_until_ready(out)

    # Reference in full f32 (tolerance widened for bf16 matmul operands/activations).
    ref = jnp.maximum(x.reshape(B, -1), 0.0) @ weight_oi.T + bias
    assert out.shape == (B, N_OUT)
    assert jnp.allclose(out, ref, atol=2e-2, rtol=2e-2)

    print("KERNEL_OK")
</pallas_src>

<mosaic_0001>
module attributes {stable_mosaic.version = 11 : i64} {
  func.func @_lowest_kernel(%arg0: memref<16x896xbf16, #tpu.memory_space<vmem>>, %arg1: memref<896x128xbf16, #tpu.memory_space<vmem>>, %arg2: memref<1x128xf32, #tpu.memory_space<vmem>>, %arg3: memref<16x128xf32, #tpu.memory_space<vmem>>) attributes {dimension_semantics = [], scalar_prefetch = 0 : i64, scratch_operands = 0 : i64, tpu.core_type = #tpu.core_type<tc>} {
    %c0 = arith.constant 0 : index
    %c0_0 = arith.constant 0 : index
    %0 = vector.load %arg0[%c0, %c0_0] : memref<16x896xbf16, #tpu.memory_space<vmem>>, vector<16x896xbf16>
    %cst = arith.constant 0.000000e+00 : bf16
    %1 = vector.broadcast %cst : bf16 to vector<16x896xbf16>
    %2 = arith.maximumf %0, %1 : vector<16x896xbf16>
    %c0_1 = arith.constant 0 : index
    %c0_2 = arith.constant 0 : index
    %3 = vector.load %arg1[%c0_1, %c0_2] : memref<896x128xbf16, #tpu.memory_space<vmem>>, vector<896x128xbf16>
    %cst_3 = arith.constant dense<0.000000e+00> : vector<16x128xf32>
    %4 = tpu.matmul %2, %3, %cst_3 {dimension_numbers = #tpu.dot_dimension_numbers<[1], [0], [0], [1], [0, 0, 1, 1], [], []>} : vector<16x896xbf16>, vector<896x128xbf16>, vector<16x128xf32> -> vector<16x128xf32>
    %c0_4 = arith.constant 0 : index
    %c0_5 = arith.constant 0 : index
    %5 = vector.load %arg2[%c0_4, %c0_5] : memref<1x128xf32, #tpu.memory_space<vmem>>, vector<1x128xf32>
    %6 = vector.broadcast %5 : vector<1x128xf32> to vector<16x128xf32>
    %7 = arith.addf %4, %6 : vector<16x128xf32>
    %c0_6 = arith.constant 0 : index
    %c0_7 = arith.constant 0 : index
    %8 = vector.load %arg3[%c0_6, %c0_7] : memref<16x128xf32, #tpu.memory_space<vmem>>, vector<16x128xf32>
    tpu.vector_store %arg3[%c0_6, %c0_7], %7 {strides = array<i32>} : memref<16x128xf32, #tpu.memory_space<vmem>>, vector<16x128xf32>,
    return
  }
}

</mosaic_0001>

<bundles_post_ra>
// kernel: _lowest_forward_impl.1
= control target key start
LH: loop header
LB: loop body
LE: loop exit
PB: predicated region body
PF: predicated region fallthrough
CT: control target
= control target key end

     0   :  { %8 = vsyncpa [#allocation3], 0  ;;  %s950_s12 = smov [#allocation2]   ;;  %s1029_s0 = inlined_call_operand.vmem [shape: bf16[16,896], index: 0, kind: input, shape index: {}]   ;;  %s1030_s1 = inlined_call_operand.hbm [shape: bf16[896,128], index: 1, kind: input, shape index: {}]   ;;  %s1031_s2 = inlined_call_operand.vmem [shape: f32[1,128], index: 2, kind: input, shape index: {}]   ;;  %s1032_s3 = inlined_call_operand.vmem [shape: f32[16,128], index: 3, kind: output, shape index: {}]  }
   0x1   :  { %s16_s13 = sshll.u32 %s950_s12, 4  ;;  %s17_s13 = int_to_ptr.vmem [resolvable:$true] %s16_s13 }
   0x2   :  { %s936_s14 = scalar_lea.vmem %s17_s13, 7168  ;;  %p941_p1 = scmp.lt.s32.totalorder %s17_s13, %s17_s13 }
   0x3   :  { %p937_p0 = scmp.ne.s32.totalorder %s17_s13, %s936_s14  ;;  %p942_p2 = scmp.lt.s32.totalorder %s936_s14, %s936_s14 }
   0x5   :  { %p943_p3 = por %p942_p2, %p941_p1 }
   0x7   :  { %p944_p4 = pnand %p943_p3, %p937_p0 }
   0x9   :  { %947 = shalt.err (!%p944_p4)
}
   0xa   :  { %s951_s15 = smov 64   ;;  %s952_s16 = smov 4  }
   0xb   :  { %22 = dma.hbm_to_vmem [thread:$0]  %s1030_s1, 7168, %s17_s13, [#allocation3], %s951_s15, %s951_s15, %s952_s16  }
   0xc   :  { %948 = dma.done.wait [#allocation3], 7168  }
   0xd   :  { %949 = vsyncadd [#allocation3], 4294960128  ;;  %v872_v0 = vld [vmem:[#allocation2 + $0x78] sm:$0xff]   ;;  %v876_v4 = vld [vmem:[#allocation2 + $0x70] sm:$0xff]   ;;  %v953_v35 = vmov 0   ;;  %v954_v42 = vmov 0.0  }
   0xe   :  { %v873_v1 = vld [vmem:[#allocation2 + $0xf8] sm:$0xff]   ;;  %771 = vmatprep.subr.bf16.mxu0 %v872_v0  ;;  %v877_v5 = vld [vmem:[#allocation2 + $0xf0] sm:$0xff]   ;;  %v880_v8 = vld [vmem:[#allocation2 + $0x68] sm:$0xff]   ;;  %vm955_vm0 = vmmov 0  }
   0xf   :  { %v874_v2 = vld [vmem:[#allocation2 + $0x38] sm:$0xff]   ;;  %793 = vmatprep.subr.bf16.mxu1 %v873_v1  ;;  %v878_v6 = vld [vmem:[#allocation2 + $0x30] sm:$0xff]   ;;  %v881_v9 = vld [vmem:[#allocation2 + $0xe8] sm:$0xff]  }
  0x10   :  { %v875_v3 = vld [vmem:[#allocation2 + $0xb8] sm:$0xff]   ;;  %772 = vmatpush3.bf16.msra.mxu0 %v874_v2  ;;  %v879_v7 = vld [vmem:[#allocation2 + $0xb0] sm:$0xff]   ;;  %v882_v10 = vld [vmem:[#allocation2 + $0x28] sm:$0xff]  }
  0x11   :  { %794 = vmatpush3.bf16.msra.mxu1 %v875_v3  ;;  %773 = vmatprep.subr.bf16.mxu0 %v876_v4  ;;  %v883_v11 = vld [vmem:[#allocation2 + $0xa8] sm:$0xff]   ;;  %v884_v12 = vld [vmem:[#allocation2 + $0x60] sm:$0xff]   ;;  %v888_v16 = vld [vmem:[#allocation2 + $0x58] sm:$0xff]  }
  0x12   :  { %795 = vmatprep.subr.bf16.mxu1 %v877_v5  ;;  %v885_v13 = vld [vmem:[#allocation2 + $0xe0] sm:$0xff]   ;;  %v889_v17 = vld [vmem:[#allocation2 + $0xd8] sm:$0xff]   ;;  %v892_v20 = vld [vmem:[#allocation2 + $0x50] sm:$0xff]  }
  0x13   :  { %v886_v14 = vld [vmem:[#allocation2 + $0x20] sm:$0xff]   ;;  %v890_v18 = vld [vmem:[#allocation2 + $0x18] sm:$0xff]   ;;  %v893_v21 = vld [vmem:[#allocation2 + $0xd0] sm:$0xff]  }
  0x14   :  { %774 = vmatpush3.bf16.msra.mxu0 %v878_v6  ;;  %v887_v15 = vld [vmem:[#allocation2 + $0xa0] sm:$0xff]   ;;  %v891_v19 = vld [vmem:[#allocation2 + $0x98] sm:$0xff]   ;;  %v894_v22 = vld [vmem:[#allocation2 + $0x10] sm:$0xff]  }
  0x15   :  { %796 = vmatpush3.bf16.msra.mxu1 %v879_v7  ;;  %775 = vmatprep.subr.bf16.mxu0 %v880_v8  ;;  %v895_v23 = vld [vmem:[#allocation2 + $0x90] sm:$0xff]   ;;  %v896_v24 = vld [vmem:[#allocation2 + $0x48] sm:$0xff]   ;;  %v900_v28 = vld [vmem:[#allocation2 + $0x40] sm:$0xff]  }
  0x16   :  { %797 = vmatprep.subr.bf16.mxu1 %v881_v9  ;;  %v897_v25 = vld [vmem:[#allocation2 + $0xc8] sm:$0xff]   ;;  %v901_v29 = vld [vmem:[#allocation2 + $0xc0] sm:$0xff]   ;;  %v904_v41 = vld [vmem:[#allocation2 + $0x178] sm:$0xff]  }
  0x17   :  { %v898_v26 = vld [vmem:[#allocation2 + $0x8] sm:$0xff]   ;;  %v902_v30 = vld [vmem:[#allocation2] sm:$0xff]   ;;  %v905_v45 = vld [vmem:[#allocation2 + $0x138] sm:$0xff]  }
  0x18   :  { %776 = vmatpush3.bf16.msra.mxu0 %v882_v10  ;;  %v899_v27 = vld [vmem:[#allocation2 + $0x88] sm:$0xff]   ;;  %v903_v31 = vld [vmem:[#allocation2 + $0x80] sm:$0xff]   ;;  %v906_v48 = vld [vmem:[#allocation2 + $0x1b8] sm:$0xff]  }
  0x19   :  { %798 = vmatpush3.bf16.msra.mxu1 %v883_v11  ;;  %777 = vmatprep.subr.bf16.mxu0 %v884_v12  ;;  %v29_v32 = vld [vmem:[%s1029_s0] sm:$0xff]  ;;  %v30_v34 = vld [vmem:[%s1029_s0 + $0x8] sm:$0xff]  ;;  %v907_v49 = vld [vmem:[#allocation2 + $0x170] sm:$0xff]  }
  0x1a   :  { %799 = vmatprep.subr.bf16.mxu1 %v885_v13  ;;  %v33_v33 = vld [vmem:[%s1029_s0 + $0x1c] sm:$0xff]  ;;  %v37_v36 = vmax.bf16 %v953_v35, %v29_v32  ;;  %v34_v38 = vld [vmem:[%s1029_s0 + $0x24] sm:$0xff]  ;;  %v38_v39 = vmax.bf16 %v953_v35, %v30_v34  ;;  %v908_v50 = vld [vmem:[#allocation2 + $0x130] sm:$0xff]  }
  0x1b   :  { %v41_v37 = vmax.bf16 %v953_v35, %v33_v33  ;;  %v42_v40 = vmax.bf16 %v953_v35, %v34_v38  ;;  %v909_v51 = vld [vmem:[#allocation2 + $0x1b0] sm:$0xff]   ;;  %v910_v52 = vld [vmem:[#allocation2 + $0x168] sm:$0xff]   ;;  %v913_v55 = vld [vmem:[#allocation2 + $0x160] sm:$0xff]  }
  0x1c   :  { %778 = vmatpush3.bf16.msra.mxu0 %v886_v14  ;;  %v911_v53 = vld [vmem:[#allocation2 + $0x128] sm:$0xff]   ;;  %v914_v56 = vld [vmem:[#allocation2 + $0x120] sm:$0xff]   ;;  %v916_v58 = vld [vmem:[#allocation2 + $0x158] sm:$0xff]  }
  0x1d   :  { %800 = vmatpush3.bf16.msra.mxu1 %v887_v15  ;;  %779 = vmatprep.subr.bf16.mxu0 %v888_v16  ;;  %v709_v43 = vcombine.high %v37_v36, %v41_v37  ;;  %v708_v44 = vcombine.low %v37_v36, %v41_v37  ;;  %v711_v46 = vcombine.high %v38_v39, %v42_v40  ;;  %v912_v54 = vld [vmem:[#allocation2 + $0x1a8] sm:$0xff]   ;;  %v915_v57 = vld [vmem:[#allocation2 + $0x1a0] sm:$0xff]   ;;  %v917_v59 = vld [vmem:[#allocation2 + $0x118] sm:$0xff]  }
  0x1e   :  { %801 = vmatprep.subr.bf16.mxu1 %v889_v17  ;;  %v710_v47 = vcombine.low %v38_v39, %v42_v40  ;;  %v918_v60 = vld [vmem:[#allocation2 + $0x198] sm:$0xff]   ;;  %v919_v61 = vld [vmem:[#allocation2 + $0x150] sm:$0xff]   ;;  %v922_v0 = vld [vmem:[#allocation2 + $0x148] sm:$0xff]  }
  0x1f   :  { %568 = vmatprep.mubr.bf16.mxu0 %v709_v43  ;;  %609 = vmatprep.mubr.bf16.mxu1 %v711_v46  ;;  %v920_v62 = vld [vmem:[#allocation2 + $0x110] sm:$0xff]   ;;  %v923_v5 = vld [vmem:[#allocation2 + $0x108] sm:$0xff]   ;;  %v925_v7 = vld [vmem:[#allocation2 + $0x140] sm:$0xff]  }
  0x20   :  { %780 = vmatpush3.bf16.msra.mxu0 %v890_v18  ;;  %v921_v63 = vld [vmem:[#allocation2 + $0x190] sm:$0xff]   ;;  %v924_v6 = vld [vmem:[#allocation2 + $0x188] sm:$0xff]   ;;  %v32_v9 = vld [vmem:[%s1029_s0 + $0x18] sm:$0xf] }
  0x21   :  { %802 = vmatpush3.bf16.msra.mxu1 %v891_v19  ;;  %781 = vmatprep.subr.bf16.mxu0 %v892_v20  ;;  %v31_v1 = vld [vmem:[%s1029_s0 + $0x10] sm:$0xff]  ;;  %v926_v11 = vld [vmem:[#allocation2 + $0x100] sm:$0xff]   ;;  %v40_v12 = vmax.bf16 %v953_v35, %v32_v9 }
  0x22   :  { %803 = vmatprep.subr.bf16.mxu1 %v893_v21  ;;  %v35_v2 = vld [vmem:[%s1029_s0 + $0x2c] sm:$0xff]  ;;  %v39_v3 = vmax.bf16 %v953_v35, %v31_v1  ;;  %v36_v10 = vld [vmem:[%s1029_s0 + $0x34] sm:$0xf]  ;;  %v927_v14 = vld [vmem:[#allocation2 + $0x180] sm:$0xff]  }
  0x23   :  { %v43_v4 = vmax.bf16 %v953_v35, %v35_v2  ;;  %v44_v13 = vmax.bf16 %v953_v35, %v36_v10 }
  0x24   :  { %782 = vmatpush3.bf16.msra.mxu0 %v894_v22 }
  0x25   :  { %804 = vmatpush3.bf16.msra.mxu1 %v895_v23  ;;  %783 = vmatprep.subr.bf16.mxu0 %v896_v24  ;;  %v713_v8 = vcombine.high %v39_v3, %v43_v4  ;;  %v712_v15 = vcombine.low %v39_v3, %v43_v4  ;;  %v714_v16 = vcombine.low %v40_v12, %v44_v13  ;;  %v707_v24 = vld [vmem:[%s1031_s2] ss:$0 sm:$0xff] }
  0x26   :  { %805 = vmatprep.subr.bf16.mxu1 %v897_v25 }
  0x28   :  { %784 = vmatpush3.bf16.msra.mxu0 %v898_v26 }
  0x29   :  { %806 = vmatpush3.bf16.msra.mxu1 %v899_v27  ;;  %785 = vmatprep.subr.bf16.mxu0 %v900_v28 }
  0x2a   :  { %807 = vmatprep.subr.bf16.mxu1 %v901_v29 }
  0x2c   :  { %786 = vmatpush3.bf16.msra.mxu0 %v902_v30 }
  0x2d   :  { %808 = vmatpush3.bf16.msra.mxu1 %v903_v31  ;;  %815 = vmatprep.subr.bf16.mxu0 %v904_v41 }
  0x2e   :  { %846 = vmatprep.subr.bf16.mxu1 %v954_v42 }
  0x2f   :  { %569 = vmatmul.mubr.bf16.vlgmr.msra.gmra.mxu0 %v708_v44 }
  0x30   :  { %610 = vmatmul.mubr.bf16.vlgmr.msra.gmra.mxu1 %v710_v47  ;;  %816 = vmatpush3.bf16.msra.mxu0 %v905_v45 }
  0x31   :  { %847 = vmatpush3.bf16.msra.mxu1 %v906_v48  ;;  %817 = vmatprep.subr.bf16.mxu0 %v907_v49 }
  0x32   :  { %848 = vmatprep.subr.bf16.mxu1 %v954_v42  ;;  %862 = vmatprep.mubr.msk.bf16.mxu1 %vm955_vm0, %v954_v42 }
  0x33   :  { %650 = vmatprep.mubr.bf16.mxu0 %v713_v8 }
  0x34   :  { %818 = vmatpush3.bf16.msra.mxu0 %v908_v50 }
  0x35   :  { %849 = vmatpush3.bf16.msra.mxu1 %v909_v51  ;;  %819 = vmatprep.subr.bf16.mxu0 %v910_v52 }
  0x36   :  { %850 = vmatprep.subr.bf16.mxu1 %v954_v42 }
  0x38   :  { %820 = vmatpush3.bf16.msra.mxu0 %v911_v53 }
  0x39   :  { %851 = vmatpush3.bf16.msra.mxu1 %v912_v54  ;;  %821 = vmatprep.subr.bf16.mxu0 %v913_v55 }
  0x3a   :  { %852 = vmatprep.subr.bf16.mxu1 %v954_v42 }
  0x3c   :  { %822 = vmatpush3.bf16.msra.mxu0 %v914_v56 }
  0x3d   :  { %853 = vmatpush3.bf16.msra.mxu1 %v915_v57  ;;  %823 = vmatprep.subr.bf16.mxu0 %v916_v58 }
  0x3e   :  { %854 = vmatprep.subr.bf16.mxu1 %v954_v42 }
  0x40   :  { %824 = vmatpush3.bf16.msra.mxu0 %v917_v59 }
  0x41   :  { %855 = vmatpush3.bf16.msra.mxu1 %v918_v60  ;;  %825 = vmatprep.subr.bf16.mxu0 %v919_v61 }
  0x42   :  { %856 = vmatprep.subr.bf16.mxu1 %v954_v42 }
  0x44   :  { %826 = vmatpush3.bf16.msra.mxu0 %v920_v62 }
  0x45   :  { %857 = vmatpush3.bf16.msra.mxu1 %v921_v63  ;;  %827 = vmatprep.subr.bf16.mxu0 %v922_v0 }
  0x46   :  { %858 = vmatprep.subr.bf16.mxu1 %v954_v42 }
  0x48   :  { %828 = vmatpush3.bf16.msra.mxu0 %v923_v5 }
  0x49   :  { %859 = vmatpush3.bf16.msra.mxu1 %v924_v6  ;;  %829 = vmatprep.subr.bf16.mxu0 %v925_v7 }
  0x4a   :  { %860 = vmatprep.subr.bf16.mxu1 %v954_v42 }
  0x4c   :  { %830 = vmatpush3.bf16.msra.mxu0 %v926_v11 }
  0x4d   :  { %861 = vmatpush3.bf16.msra.mxu1 %v927_v14 }
  0x4f   :  { %651 = vmatmul.mubr.bf16.vlgmr.msra.gmra.mxu0 %v712_v15 }
  0x50   :  { %863 = vmatmul.mubr.bf16.vlgmr.msra.gmra.mxu1 %v714_v16 }
  0xef   :  { %v787_v17 = vpop.f32.mrf.mxu0 }
  0xf0   :  { %v809_v18 = vpop.f32.mrf.mxu1 }
  0xf1   :  { %v788_v19 = vpop.f32.mrf.mxu0 }
  0xf2   :  { %v810_v20 = vpop.f32.mrf.mxu1  ;;  %v789_v22 = vadd.f32 %v788_v19, %v787_v17 }
  0xf3   :  { %v790_v21 = vpop.f32.mrf.mxu0  ;;  %v811_v27 = vadd.f32 %v810_v20, %v809_v18 }
  0xf4   :  { %v812_v23 = vpop.f32.mrf.mxu1  ;;  %v571_v26 = vadd.f32 %v789_v22, %v707_v24 }
  0xf5   :  { %v791_v25 = vpop.f32.mrf.mxu0 }
  0xf6   :  { %v792_v28 = vadd.f32 %v791_v25, %v790_v21  ;;  %v813_v29 = vpop.f32.mrf.mxu1  ;;  %v612_v33 = vadd.f32 %v811_v27, %v571_v26 }
  0xf7   :  { %v814_v35 = vadd.f32 %v813_v29, %v812_v23 }
  0xf8   :  { %v574_v34 = vadd.f32 %v792_v28, %v707_v24 }
  0xfa   :  { %v615_v42 = vadd.f32 %v814_v35, %v574_v34 }
 0x10f   :  { %v831_v30 = vpop.f32.mrf.mxu0 }
 0x110   :  { %v693_v31 = vpop.f32.mrf.mxu1 }
 0x111   :  { %v832_v32 = vpop.f32.mrf.mxu0 }
 0x112   :  { %v833_v36 = vadd.f32 %v832_v32, %v831_v30  ;;  %v864_v37 = vpop.f32.mrf.mxu1 }
 0x113   :  { %v834_v38 = vpop.f32.mrf.mxu0 }
 0x114   :  { %v653_v39 = vadd.f32 %v833_v36, %v612_v33  ;;  %v696_v40 = vpop.f32.mrf.mxu1 }
 0x115   :  { %v835_v41 = vpop.f32.mrf.mxu0 }
 0x116   :  { %v694_v43 = vadd.f32 %v693_v31, %v653_v39  ;;  %v836_v44 = vadd.f32 %v835_v41, %v834_v38  ;;  %v865_v45 = vpop.f32.mrf.mxu1 }
 0x118   :  { %700 = vst [vmem:[%s1032_s3] sm:$0xff] %v694_v43  ;;  %v656_v46 = vadd.f32 %v836_v44, %v615_v42 }
 0x11a   :  { %v697_v47 = vadd.f32 %v696_v40, %v656_v46 }
 0x11c   :  { %701 = vst [vmem:[%s1032_s3 + $0x8] sm:$0xff] %v697_v47 }
 0x11d   :  { %706 = vsyncpa [#allocation3], 1 }

</bundles_post_ra>
